<compile_context>
chip_gen: v7x
topology: tpu7x:2x2x1
jax: 0.10.0
libtpu: 0.0.40
codegen_flags: <defaults>
</compile_context>

<pallas_src>
import jax
import jax.numpy as jnp
from jax.experimental import pallas as pl
from jax.experimental.pallas import tpu as pltpu

SUBLANE = 8  # TPU sublane width (second-to-last dim tiling unit)


def _round_up(n, m):
    return (n + m - 1) // m * m


def eqfusion_kernel(x_ref, inj1_ref, inj2_ref, res1_ref, res2_ref,
                    w1_ref, w2_ref, b12_ref, w3_ref, b3_ref, o_ref):
    """One batch tile of the fused EQFusionV2 forward.

    h     = inj1 @ W1 + inj2 @ W2 + (b1 + b2)   (== conv1(inj1) + conv2(inj2))
    fused = x * h + res1 + res2                 (== x*h1 + x*h2 + res1 + res2)
    out   = fused @ W3 + b3                     (== conv3(fused))
    """
    h = (jnp.dot(inj1_ref[...], w1_ref[...], preferred_element_type=jnp.float32)
         + jnp.dot(inj2_ref[...], w2_ref[...], preferred_element_type=jnp.float32)
         + b12_ref[...])
    fused = x_ref[...] * h + res1_ref[...] + res2_ref[...]
    # Cast back to the input dtype before the second MXU pass (no-op for f32,
    # avoids f32 multi-pass MXU issue for bf16 inputs).
    o_ref[...] = (jnp.dot(fused.astype(x_ref.dtype), w3_ref[...],
                          preferred_element_type=jnp.float32)
                  + b3_ref[...]).astype(o_ref.dtype)


def eqfusion_v2_block(x, inj1, inj2, res1, res2, params, *, tile_b=2048):
    """Fused, batch-tiled EQFusionV2Block forward (no wrapper-side data passes)."""
    w1, b1, w2, b2, w3, b3 = params
    B, D = x.shape
    K1, K2 = inj1.shape[1], inj2.shape[1]
    out_dtype = x.dtype
    itemsize = jnp.dtype(out_dtype).itemsize

    # Tiny parameter pre-sum (1 x D) — negligible traffic, saves a VPU add/iter.
    b12 = b1 + b2

    # ---- batch tiling ----
    # Multiple of 8 sublanes, capped by tile_b, and also capped at ~B/2 so the
    # grid has >= 2 parallel steps whenever the batch allows it (v7x megacore;
    # harmless on single-TC v5e/v6e).  Ragged last tile is handled by Pallas:
    # out-of-range rows compute garbage but their writes are dropped, which is
    # safe because each output row depends only on its own input row.
    half_b = _round_up(pl.cdiv(B, 2), SUBLANE)
    TB = max(SUBLANE, min(_round_up(tile_b, SUBLANE), half_b))
    grid = (pl.cdiv(B, TB),)

    # Per-batch-tile streamed operands (last dim = full feature width).
    row_spec = lambda cols: pl.BlockSpec((TB, cols), lambda i: (i, 0))
    # Parameters: index_map ignores the batch step -> VMEM-resident across steps.
    park_spec = lambda rows, cols: pl.BlockSpec((rows, cols), lambda i: (0, 0))

    flops = 2 * B * D * (K1 + K2 + D)
    bytes_accessed = itemsize * (
        x.size + inj1.size + inj2.size + res1.size + res2.size
        + w1.size + w2.size + b12.size + w3.size + b3.size
        + B * D)  # output
    cost = pl.CostEstimate(flops=flops, transcendentals=0,
                           bytes_accessed=bytes_accessed)

    return pl.pallas_call(
        eqfusion_kernel,
        out_shape=jax.ShapeDtypeStruct((B, D), out_dtype),
        grid=grid,
        in_specs=[row_spec(D),          # x
                  row_spec(K1),         # inj1
                  row_spec(K2),         # inj2
                  row_spec(D),          # res1
                  row_spec(D),          # res2
                  park_spec(K1, D),     # W1
                  park_spec(K2, D),     # W2
                  park_spec(1, D),      # b1 + b2
                  park_spec(D, D),      # W3
                  park_spec(1, D)],     # b3
        out_specs=row_spec(D),
        compiler_params=pltpu.CompilerParams(
            dimension_semantics=("parallel",)),   # megacore sharding on v7x
        cost_estimate=cost,
    )(x, inj1, inj2, res1, res2, w1, w2, b12, w3, b3)


def init_params(key, branch1_dim, branch2_dim, out_dim):
    """Deterministic synthetic Linear params (PyTorch-style uniform fan-in init)."""
    ks = jax.random.split(key, 6)

    def linear(kw, kb, fan_in, fan_out):
        bound = 1.0 / jnp.sqrt(fan_in)
        # stored as [in, out] (transposed vs. torch's [out, in])
        w = jax.random.uniform(kw, (fan_in, fan_out), jnp.float32, -bound, bound)
        b = jax.random.uniform(kb, (1, fan_out), jnp.float32, -bound, bound)
        return w, b

    w1, b1 = linear(ks[0], ks[1], branch1_dim, out_dim)
    w2, b2 = linear(ks[2], ks[3], branch2_dim, out_dim)
    w3, b3 = linear(ks[4], ks[5], out_dim, out_dim)
    return (w1, b1, w2, b2, w3, b3)


def reference(x, inj1, inj2, res1, res2, params):
    """Faithful (unfused) reference of the PyTorch module."""
    w1, b1, w2, b2, w3, b3 = params
    h1 = inj1 @ w1 + b1
    h2 = inj2 @ w2 + b2
    fused = x * h1 + x * h2 + res1 + res2
    return fused @ w3 + b3


if __name__ == "__main__":
    branch1_dim, branch2_dim, out_dim = 16, 24, 32
    key = jax.random.PRNGKey(0)
    kp, kdata = jax.random.split(key)
    params = init_params(kp, branch1_dim, branch2_dim, out_dim)

    def make_inputs(k, B):
        kx, k1, k2, kr1, kr2 = jax.random.split(k, 5)
        x    = jax.random.normal(kx,  (B, out_dim),     jnp.float32)
        inj1 = jax.random.normal(k1,  (B, branch1_dim), jnp.float32)
        inj2 = jax.random.normal(k2,  (B, branch2_dim), jnp.float32)
        res1 = jax.random.normal(kr1, (B, out_dim),     jnp.float32)
        res2 = jax.random.normal(kr2, (B, out_dim),     jnp.float32)
        return x, inj1, inj2, res1, res2

    ka, kb = jax.random.split(kdata)

    # Small batch (single grid step).
    inputs_small = make_inputs(ka, 8)
    out_small = jax.block_until_ready(eqfusion_v2_block(*inputs_small, params))
    ref_small = reference(*inputs_small, params)
    assert out_small.shape == ref_small.shape
    assert jnp.allclose(out_small, ref_small, atol=1e-4, rtol=1e-5), \
        "small-batch mismatch vs reference"

    # Larger, non-multiple batch (>= 2 parallel grid steps + ragged last tile).
    inputs_big = make_inputs(kb, 300)
    out_big = jax.block_until_ready(eqfusion_v2_block(*inputs_big, params))
    ref_big = reference(*inputs_big, params)
    assert out_big.shape == ref_big.shape
    assert jnp.allclose(out_big, ref_big, atol=1e-4, rtol=1e-5), \
        "large-batch mismatch vs reference"

    print("KERNEL_OK")
</pallas_src>

<mosaic_0001>
module attributes {stable_mosaic.version = 11 : i64} {
  func.func @eqfusion_kernel(%arg0: i32, %arg1: memref<8x32xf32, #tpu.memory_space<vmem>>, %arg2: memref<8x16xf32, #tpu.memory_space<vmem>>, %arg3: memref<8x24xf32, #tpu.memory_space<vmem>>, %arg4: memref<8x32xf32, #tpu.memory_space<vmem>>, %arg5: memref<8x32xf32, #tpu.memory_space<vmem>>, %arg6: memref<16x32xf32, #tpu.memory_space<vmem>>, %arg7: memref<24x32xf32, #tpu.memory_space<vmem>>, %arg8: memref<1x32xf32, #tpu.memory_space<vmem>>, %arg9: memref<32x32xf32, #tpu.memory_space<vmem>>, %arg10: memref<1x32xf32, #tpu.memory_space<vmem>>, %arg11: memref<8x32xf32, #tpu.memory_space<vmem>>) attributes {dimension_semantics = [#tpu.dimension_semantics<parallel>], iteration_bounds = array<i64: 1>, scalar_prefetch = 0 : i64, scratch_operands = 0 : i64, tpu.core_type = #tpu.core_type<tc>, window_params = [{transform_indices = @transform_0, window_bounds = array<i64: 8, 32>}, {transform_indices = @transform_1, window_bounds = array<i64: 8, 16>}, {transform_indices = @transform_2, window_bounds = array<i64: 8, 24>}, {transform_indices = @transform_3, window_bounds = array<i64: 8, 32>}, {transform_indices = @transform_4, window_bounds = array<i64: 8, 32>}, {pipeline_mode = #tpu.pipeline_mode<synchronous>, transform_indices = @transform_5, window_bounds = array<i64: 16, 32>}, {pipeline_mode = #tpu.pipeline_mode<synchronous>, transform_indices = @transform_6, window_bounds = array<i64: 24, 32>}, {pipeline_mode = #tpu.pipeline_mode<synchronous>, transform_indices = @transform_7, window_bounds = array<i64: 1, 32>}, {pipeline_mode = #tpu.pipeline_mode<synchronous>, transform_indices = @transform_8, window_bounds = array<i64: 32, 32>}, {pipeline_mode = #tpu.pipeline_mode<synchronous>, transform_indices = @transform_9, window_bounds = array<i64: 1, 32>}, {transform_indices = @transform_10, window_bounds = array<i64: 8, 32>}]} {
    %c0 = arith.constant 0 : index
    %c0_0 = arith.constant 0 : index
    %0 = vector.load %arg2[%c0, %c0_0] : memref<8x16xf32, #tpu.memory_space<vmem>>, vector<8x16xf32>
    %c0_1 = arith.constant 0 : index
    %c0_2 = arith.constant 0 : index
    %1 = vector.load %arg6[%c0_1, %c0_2] : memref<16x32xf32, #tpu.memory_space<vmem>>, vector<16x32xf32>
    %cst = arith.constant dense<0.000000e+00> : vector<8x32xf32>
    %2 = tpu.matmul %0, %1, %cst {dimension_numbers = #tpu.dot_dimension_numbers<[1], [0], [0], [1], [0, 0, 1, 1], [], []>} : vector<8x16xf32>, vector<16x32xf32>, vector<8x32xf32> -> vector<8x32xf32>
    %c0_3 = arith.constant 0 : index
    %c0_4 = arith.constant 0 : index
    %3 = vector.load %arg3[%c0_3, %c0_4] : memref<8x24xf32, #tpu.memory_space<vmem>>, vector<8x24xf32>
    %c0_5 = arith.constant 0 : index
    %c0_6 = arith.constant 0 : index
    %4 = vector.load %arg7[%c0_5, %c0_6] : memref<24x32xf32, #tpu.memory_space<vmem>>, vector<24x32xf32>
    %cst_7 = arith.constant dense<0.000000e+00> : vector<8x32xf32>
    %5 = tpu.matmul %3, %4, %cst_7 {dimension_numbers = #tpu.dot_dimension_numbers<[1], [0], [0], [1], [0, 0, 1, 1], [], []>} : vector<8x24xf32>, vector<24x32xf32>, vector<8x32xf32> -> vector<8x32xf32>
    %6 = arith.addf %2, %5 : vector<8x32xf32>
    %c0_8 = arith.constant 0 : index
    %c0_9 = arith.constant 0 : index
    %7 = vector.load %arg8[%c0_8, %c0_9] : memref<1x32xf32, #tpu.memory_space<vmem>>, vector<1x32xf32>
    %8 = vector.broadcast %7 : vector<1x32xf32> to vector<8x32xf32>
    %9 = arith.addf %6, %8 : vector<8x32xf32>
    %c0_10 = arith.constant 0 : index
    %c0_11 = arith.constant 0 : index
    %10 = vector.load %arg1[%c0_10, %c0_11] : memref<8x32xf32, #tpu.memory_space<vmem>>, vector<8x32xf32>
    %11 = arith.mulf %10, %9 : vector<8x32xf32>
    %c0_12 = arith.constant 0 : index
    %c0_13 = arith.constant 0 : index
    %12 = vector.load %arg4[%c0_12, %c0_13] : memref<8x32xf32, #tpu.memory_space<vmem>>, vector<8x32xf32>
    %13 = arith.addf %11, %12 : vector<8x32xf32>
    %c0_14 = arith.constant 0 : index
    %c0_15 = arith.constant 0 : index
    %14 = vector.load %arg5[%c0_14, %c0_15] : memref<8x32xf32, #tpu.memory_space<vmem>>, vector<8x32xf32>
    %15 = arith.addf %13, %14 : vector<8x32xf32>
    %c0_16 = arith.constant 0 : index
    %c0_17 = arith.constant 0 : index
    %16 = vector.load %arg9[%c0_16, %c0_17] : memref<32x32xf32, #tpu.memory_space<vmem>>, vector<32x32xf32>
    %cst_18 = arith.constant dense<0.000000e+00> : vector<8x32xf32>
    %17 = tpu.matmul %15, %16, %cst_18 {dimension_numbers = #tpu.dot_dimension_numbers<[1], [0], [0], [1], [0, 0, 1, 1], [], []>} : vector<8x32xf32>, vector<32x32xf32>, vector<8x32xf32> -> vector<8x32xf32>
    %c0_19 = arith.constant 0 : index
    %c0_20 = arith.constant 0 : index
    %18 = vector.load %arg10[%c0_19, %c0_20] : memref<1x32xf32, #tpu.memory_space<vmem>>, vector<1x32xf32>
    %19 = vector.broadcast %18 : vector<1x32xf32> to vector<8x32xf32>
    %20 = arith.addf %17, %19 : vector<8x32xf32>
    %c0_21 = arith.constant 0 : index
    %c0_22 = arith.constant 0 : index
    %21 = vector.load %arg11[%c0_21, %c0_22] : memref<8x32xf32, #tpu.memory_space<vmem>>, vector<8x32xf32>
    tpu.vector_store %arg11[%c0_21, %c0_22], %20 {strides = array<i32>} : memref<8x32xf32, #tpu.memory_space<vmem>>, vector<8x32xf32>,
    return
  }
  func.func @transform_0(%arg0: i32) -> (i32, i32) {
    %c0_i32 = arith.constant 0 : i32
    %c0_i32_0 = arith.constant 0 : i32
    return %arg0, %c0_i32 : i32, i32
  }
  func.func @transform_1(%arg0: i32) -> (i32, i32) {
    %c0_i32 = arith.constant 0 : i32
    %c0_i32_0 = arith.constant 0 : i32
    return %arg0, %c0_i32 : i32, i32
  }
  func.func @transform_2(%arg0: i32) -> (i32, i32) {
    %c0_i32 = arith.constant 0 : i32
    %c0_i32_0 = arith.constant 0 : i32
    return %arg0, %c0_i32 : i32, i32
  }
  func.func @transform_3(%arg0: i32) -> (i32, i32) {
    %c0_i32 = arith.constant 0 : i32
    %c0_i32_0 = arith.constant 0 : i32
    return %arg0, %c0_i32 : i32, i32
  }
  func.func @transform_4(%arg0: i32) -> (i32, i32) {
    %c0_i32 = arith.constant 0 : i32
    %c0_i32_0 = arith.constant 0 : i32
    return %arg0, %c0_i32 : i32, i32
  }
  func.func @transform_5(%arg0: i32) -> (i32, i32) {
    %c0_i32 = arith.constant 0 : i32
    %c0_i32_0 = arith.constant 0 : i32
    %c0_i32_1 = arith.constant 0 : i32
    return %c0_i32, %c0_i32_0 : i32, i32
  }
  func.func @transform_6(%arg0: i32) -> (i32, i32) {
    %c0_i32 = arith.constant 0 : i32
    %c0_i32_0 = arith.constant 0 : i32
    %c0_i32_1 = arith.constant 0 : i32
    return %c0_i32, %c0_i32_0 : i32, i32
  }
  func.func @transform_7(%arg0: i32) -> (i32, i32) {
    %c0_i32 = arith.constant 0 : i32
    %c0_i32_0 = arith.constant 0 : i32
    %c0_i32_1 = arith.constant 0 : i32
    return %c0_i32, %c0_i32_0 : i32, i32
  }
  func.func @transform_8(%arg0: i32) -> (i32, i32) {
    %c0_i32 = arith.constant 0 : i32
    %c0_i32_0 = arith.constant 0 : i32
    %c0_i32_1 = arith.constant 0 : i32
    return %c0_i32, %c0_i32_0 : i32, i32
  }
  func.func @transform_9(%arg0: i32) -> (i32, i32) {
    %c0_i32 = arith.constant 0 : i32
    %c0_i32_0 = arith.constant 0 : i32
    %c0_i32_1 = arith.constant 0 : i32
    return %c0_i32, %c0_i32_0 : i32, i32
  }
  func.func @transform_10(%arg0: i32) -> (i32, i32) {
    %c0_i32 = arith.constant 0 : i32
    %c0_i32_0 = arith.constant 0 : i32
    return %arg0, %c0_i32 : i32, i32
  }
}

</mosaic_0001>

<bundles_post_ra>
// kernel: tpu_custom_call.1
= control target key start
LH: loop header
LB: loop body
LE: loop exit
PB: predicated region body
PF: predicated region fallthrough
CT: control target
= control target key end

     0   :  { %15 = vsyncpa [#allocation3], 0  ;;  %s834_s0 = inlined_call_operand.hbm [shape: f32[8,32], index: 0, kind: input, shape index: {}]   ;;  %s835_s1 = inlined_call_operand.hbm [shape: f32[8,16], index: 1, kind: input, shape index: {}]   ;;  %s836_s2 = inlined_call_operand.hbm [shape: f32[8,24], index: 2, kind: input, shape index: {}]   ;;  %s837_s3 = inlined_call_operand.hbm [shape: f32[8,32], index: 3, kind: input, shape index: {}]   ;;  %s838_s4 = inlined_call_operand.hbm [shape: f32[8,32], index: 4, kind: input, shape index: {}]   ;;  %s839_s5 = inlined_call_operand.vmem [shape: f32[16,32], index: 5, kind: input, shape index: {}]   ;;  %s840_s6 = inlined_call_operand.hbm [shape: f32[24,32], index: 6, kind: input, shape index: {}]   ;;  %s841_s7 = inlined_call_operand.vmem [shape: f32[1,32], index: 7, kind: input, shape index: {}]   ;;  %s842_s8 = inlined_call_operand.hbm [shape: f32[32,32], index: 8, kind: input, shape index: {}]   ;;  %s843_s9 = inlined_call_operand.vmem [shape: f32[1,32], index: 9, kind: input, shape index: {}]   ;;  %s844_s10 = inlined_call_operand.hbm [shape: f32[8,32], index: 10, kind: output, shape index: {}]  }
   0x1   :  { %16 = vsyncpa [#allocation6], 0 }
   0x2   :  { %17 = vsyncpa [#allocation9], 0 }
   0x3   :  { %18 = vsyncpa [#allocation12], 0 }
   0x4   :  { %19 = vsyncpa [#allocation4], 0  ;;  %s649_s13 = smov [#allocation5]   ;;  %s650_s15 = smov [#allocation8]  }
   0x5   :  { %s36_s14 = sshll.u32 %s649_s13, 4  ;;  %s56_s16 = sshll.u32 %s650_s15, 4  ;;  %s37_s14 = int_to_ptr.vmem [resolvable:$true] %s36_s14  ;;  %s57_s16 = int_to_ptr.vmem [resolvable:$true] %s56_s16 }
   0x6   :  { %s463_s19 = scalar_lea.hbm %s835_s1, 128 }
   0x7   :  { %p464_p0 = scmp.ne.s32.totalorder %s835_s1, %s463_s19  ;;  %p467_p1 = scmp.lt.u32.totalorder %s463_s19, %s835_s1 }
   0x9   :  { %p469_p2 = pnand %p467_p1, %p464_p0 }
   0xb   :  { %472 = shalt.err (!%p469_p2)
}
   0xc   :  { %s473_s24 = scalar_lea.vmem %s37_s14, 128  ;;  %p478_p4 = scmp.lt.s32.totalorder %s37_s14, %s37_s14 }
   0xd   :  { %p474_p3 = scmp.ne.s32.totalorder %s37_s14, %s473_s24  ;;  %p479_p5 = scmp.lt.s32.totalorder %s473_s24, %s473_s24 }
   0xf   :  { %p480_p6 = por %p479_p5, %p478_p4 }
  0x11   :  { %p481_p7 = pnand %p480_p6, %p474_p3 }
  0x13   :  { %484 = shalt.err (!%p481_p7)
}
  0x14   :  { %39 = dma.hbm_to_vmem [thread:$0]  %s835_s1, 128, %s37_s14, [#allocation6]  }
  0x15   :  { %s485_s29 = scalar_lea.hbm %s837_s3, 128 }
  0x16   :  { %p486_p8 = scmp.ne.s32.totalorder %s837_s3, %s485_s29  ;;  %p489_p9 = scmp.lt.u32.totalorder %s485_s29, %s837_s3 }
  0x18   :  { %p491_p10 = pnand %p489_p9, %p486_p8 }
  0x1a   :  { %494 = shalt.err (!%p491_p10)
}
  0x1b   :  { %s495_s15 = scalar_lea.vmem %s57_s16, 128  ;;  %p500_p12 = scmp.lt.s32.totalorder %s57_s16, %s57_s16 }
  0x1c   :  { %p496_p11 = scmp.ne.s32.totalorder %s57_s16, %s495_s15  ;;  %p501_p13 = scmp.lt.s32.totalorder %s495_s15, %s495_s15 }
  0x1e   :  { %p502_p0 = por %p501_p13, %p500_p12 }
  0x20   :  { %p503_p1 = pnand %p502_p0, %p496_p11 }
  0x22   :  { %506 = shalt.err (!%p503_p1)
}
  0x23   :  { %59 = dma.hbm_to_vmem [thread:$0]  %s837_s3, 128, %s57_s16, [#allocation9]  }
  0x24   :  { %s651_s17 = smov [#allocation11]   ;;  %s507_s21 = scalar_lea.hbm %s840_s6, 384 }
  0x25   :  { %s77_s18 = sshll.u32 %s651_s17, 4  ;;  %p508_p2 = scmp.ne.s32.totalorder %s840_s6, %s507_s21  ;;  %s78_s18 = int_to_ptr.vmem [resolvable:$true] %s77_s18 }
  0x26   :  { %p511_p3 = scmp.lt.u32.totalorder %s507_s21, %s840_s6 }
  0x28   :  { %p513_p4 = pnand %p511_p3, %p508_p2 }
  0x2a   :  { %516 = shalt.err (!%p513_p4)
}
  0x2b   :  { %s517_s26 = scalar_lea.vmem %s78_s18, 384  ;;  %p522_p6 = scmp.lt.s32.totalorder %s78_s18, %s78_s18 }
  0x2c   :  { %p518_p5 = scmp.ne.s32.totalorder %s78_s18, %s517_s26  ;;  %p523_p7 = scmp.lt.s32.totalorder %s517_s26, %s517_s26 }
  0x2e   :  { %p524_p8 = por %p523_p7, %p522_p6 }
  0x30   :  { %p525_p9 = pnand %p524_p8, %p518_p5 }
  0x32   :  { %528 = shalt.err (!%p525_p9)
}
  0x33   :  { %s652_s3 = smov 128   ;;  %s653_s16 = smov 8  }
  0x34   :  { %83 = dma.hbm_to_vmem [thread:$0]  %s840_s6, 384, %s78_s18, [#allocation12], %s652_s3, %s652_s3, %s653_s16  }
  0x35   :  { %s654_s29 = smov [#allocation2]   ;;  %s655_s11 = smov [#allocation7]  }
  0x36   :  { %s26_s30 = sshll.u32 %s654_s29, 4  ;;  %s46_s12 = sshll.u32 %s655_s11, 4  ;;  %s27_s30 = int_to_ptr.vmem [resolvable:$true] %s26_s30  ;;  %s47_s12 = int_to_ptr.vmem [resolvable:$true] %s46_s12 }
  0x37   :  { %s529_s1 = scalar_lea.hbm %s834_s0, 128 }
  0x38   :  { %p530_p10 = scmp.ne.s32.totalorder %s834_s0, %s529_s1  ;;  %p533_p11 = scmp.lt.u32.totalorder %s529_s1, %s834_s0 }
  0x3a   :  { %p535_p12 = pnand %p533_p11, %p530_p10 }
  0x3c   :  { %538 = shalt.err (!%p535_p12)
}
  0x3d   :  { %s539_s6 = scalar_lea.vmem %s27_s30, 128  ;;  %p544_p0 = scmp.lt.s32.totalorder %s27_s30, %s27_s30 }
  0x3e   :  { %p540_p13 = scmp.ne.s32.totalorder %s27_s30, %s539_s6  ;;  %p545_p1 = scmp.lt.s32.totalorder %s539_s6, %s539_s6 }
  0x40   :  { %p546_p2 = por %p545_p1, %p544_p0 }
  0x42   :  { %p547_p3 = pnand %p546_p2, %p540_p13 }
  0x44   :  { %550 = shalt.err (!%p547_p3)
}
  0x45   :  { %29 = dma.hbm_to_vmem [thread:$0]  %s834_s0, 128, %s27_s30, [#allocation3]  }
  0x46   :  { %s551_s24 = scalar_lea.hbm %s836_s2, 128 }
  0x47   :  { %p552_p4 = scmp.ne.s32.totalorder %s836_s2, %s551_s24  ;;  %p555_p5 = scmp.lt.u32.totalorder %s551_s24, %s836_s2 }
  0x49   :  { %p557_p6 = pnand %p555_p5, %p552_p4 }
  0x4b   :  { %560 = shalt.err (!%p557_p6)
}
  0x4c   :  { %s561_s29 = scalar_lea.vmem %s47_s12, 128  ;;  %p566_p8 = scmp.lt.s32.totalorder %s47_s12, %s47_s12 }
  0x4d   :  { %p562_p7 = scmp.ne.s32.totalorder %s47_s12, %s561_s29  ;;  %p567_p9 = scmp.lt.s32.totalorder %s561_s29, %s561_s29 }
  0x4f   :  { %p568_p10 = por %p567_p9, %p566_p8 }
  0x51   :  { %p569_p11 = pnand %p568_p10, %p562_p7 }
  0x53   :  { %572 = shalt.err (!%p569_p11)
}
  0x54   :  { %49 = dma.hbm_to_vmem [thread:$0]  %s836_s2, 128, %s47_s12, [#allocation6]  }
  0x55   :  { %s656_s11 = smov [#allocation10]   ;;  %s657_s15 = smov [#allocation13]  }
  0x56   :  { %s66_s13 = sshll.u32 %s656_s11, 4  ;;  %s91_s1 = sshll.u32 %s657_s15, 4  ;;  %s67_s13 = int_to_ptr.vmem [resolvable:$true] %s66_s13  ;;  %s92_s1 = int_to_ptr.vmem [resolvable:$true] %s91_s1 }
  0x57   :  { %s573_s19 = scalar_lea.hbm %s838_s4, 128 }
  0x58   :  { %p574_p12 = scmp.ne.s32.totalorder %s838_s4, %s573_s19  ;;  %p577_p13 = scmp.lt.u32.totalorder %s573_s19, %s838_s4 }
  0x5a   :  { %p579_p0 = pnand %p577_p13, %p574_p12 }
  0x5c   :  { %582 = shalt.err (!%p579_p0)
}
  0x5d   :  { %s583_s2 = scalar_lea.vmem %s67_s13, 128  ;;  %p588_p2 = scmp.lt.s32.totalorder %s67_s13, %s67_s13 }
  0x5e   :  { %p584_p1 = scmp.ne.s32.totalorder %s67_s13, %s583_s2  ;;  %p589_p3 = scmp.lt.s32.totalorder %s583_s2, %s583_s2 }
  0x60   :  { %p590_p4 = por %p589_p3, %p588_p2 }
  0x62   :  { %p591_p5 = pnand %p590_p4, %p584_p1 }
  0x64   :  { %594 = shalt.err (!%p591_p5)
}
  0x65   :  { %69 = dma.hbm_to_vmem [thread:$0]  %s838_s4, 128, %s67_s13, [#allocation9]  }
  0x66   :  { %s595_s25 = scalar_lea.hbm %s842_s8, 512 }
  0x67   :  { %p596_p6 = scmp.ne.s32.totalorder %s842_s8, %s595_s25  ;;  %p599_p7 = scmp.lt.u32.totalorder %s595_s25, %s842_s8 }
  0x69   :  { %p601_p8 = pnand %p599_p7, %p596_p6 }
  0x6b   :  { %604 = shalt.err (!%p601_p8)
}
  0x6c   :  { %s605_s0 = scalar_lea.vmem %s92_s1, 512  ;;  %p610_p10 = scmp.lt.s32.totalorder %s92_s1, %s92_s1 }
  0x6d   :  { %p606_p9 = scmp.ne.s32.totalorder %s92_s1, %s605_s0  ;;  %p611_p11 = scmp.lt.s32.totalorder %s605_s0, %s605_s0 }
  0x6f   :  { %p612_p12 = por %p611_p11, %p610_p10 }
  0x71   :  { %p613_p13 = pnand %p612_p12, %p606_p9 }
  0x73   :  { %616 = shalt.err (!%p613_p13)
}
  0x74   :  { %97 = dma.hbm_to_vmem [thread:$0]  %s842_s8, 512, %s92_s1, [#allocation12], %s652_s3, %s652_s3, %s653_s16  }
  0x75   :  { %639 = dma.done.wait [#allocation3], 128  }
  0x76   :  { %640 = vsyncadd [#allocation3], 4294967168 }
  0x77   :  { %641 = dma.done.wait [#allocation6], 256  }
  0x78   :  { %642 = vsyncadd [#allocation6], 4294967040 }
  0x79   :  { %643 = dma.done.wait [#allocation9], 256  }
  0x7a   :  { %644 = vsyncadd [#allocation9], 4294967040 }
  0x7b   :  { %645 = dma.done.wait [#allocation12], 896  }
  0x7c   :  { %646 = vsyncadd [#allocation12], 4294966400  ;;  %v658_v0 = vmov 0.0|0.0   ;;  %vm659_vm0 = vmmov 0   ;;  %v660_v1 = vmov 0.0   ;;  %v125_v2 = vld [vmem:[#allocation11] sm:$0xff] }
  0x7d   :  { %438 = vmatprep.subr.bf16.mxu0 %v658_v0  ;;  %417 = vmatprep.mubr.msk.f32.mxu0 %vm659_vm0, %v660_v1  ;;  %v126_v3 = vld [vmem:[#allocation11 + $0x8] sm:$0xff]  ;;  %v123_v6 = vld [vmem:[%s839_s5 + $0x8] sm:$0xff]  ;;  %vm128_vm1 = vcmask 195584   ;;  %v121_v10 = vld [vmem:[#allocation5] sm:$0xff]  ;;  %vm202_vm2 = vcmask 130048   ;;  %vm301_vm3 = vcmask 261120  }
  0x7e   :  { %444 = vmatprep.subr.bf16.mxu1 %v658_v0  ;;  %435 = vmatprep.mubr.msk.f32.mxu1 %vm659_vm0, %v660_v1  ;;  %v439_v4 = vpack.c.bf16 %v126_v3, %v125_v2  ;;  %v122_v5 = vld [vmem:[%s839_s5] sm:$0xff]  ;;  %v127_v7 = vld [vmem:[#allocation11 + $0x10] sm:$0xff]  ;;  %v290_v11 = vld [vmem:[#allocation13] sm:$0xff]  ;;  %s661_s14 = smov [#allocation14]  }
  0x7f   :  { %v124_v8 = vld [vmem:[#allocation7] sm:$0xff]  ;;  %v442_v9 = vpack.c.bf16 %v123_v6, %v122_v5  ;;  %v291_v12 = vld [vmem:[#allocation13 + $0x8] sm:$0xff]  ;;  %v293_v15 = vld [vmem:[#allocation13 + $0x18] sm:$0xff]  ;;  %s382_s17 = sshll.u32 %s661_s14, 4  ;;  %s383_s17 = int_to_ptr.vmem [resolvable:$true] %s382_s17 }
  0x80   :  { %440 = vmatpush3.bf16.msra.mxu0 %v439_v4  ;;  %v445_v13 = vpack.c.bf16 %v291_v12, %v290_v11  ;;  %v292_v14 = vld [vmem:[#allocation13 + $0x10] sm:$0xff]  ;;  %v284_v23 = vld [vmem:[#allocation2] sm:$0xff]  ;;  %v286_v25 = vld [vmem:[#allocation8] sm:$0xff]  ;;  %p622_p1 = scmp.lt.s32.totalorder %s383_s17, %s383_s17 }
  0x81   :  { %415 = vmatprep.subr.mxu0 %v660_v1  ;;  %v448_v16 = vpack.c.bf16 %v293_v15, %v292_v14  ;;  %v396_v20 = vld [vmem:[%s841_s7] ss:$0 sm:$0xff]  ;;  %v288_v27 = vld [vmem:[#allocation10] sm:$0xff]  ;;  %s617_s7 = scalar_lea.vmem %s383_s17, 128 }
  0x82   :  { %446 = vmatpush3.bf16.msra.mxu1 %v445_v13  ;;  %v397_v30 = vld [vmem:[%s843_s9] ss:$0 sm:$0xff]  ;;  %p618_p0 = scmp.ne.s32.totalorder %s383_s17, %s617_s7  ;;  %p623_p2 = scmp.lt.s32.totalorder %s617_s7, %s617_s7 }
  0x83   :  { %447 = vmatprep.subr.bf16.mxu1 %v658_v0 }
  0x84   :  { %416 = vmatpush3.msra.mxu0 %v127_v7  ;;  %p624_p3 = por %p623_p2, %p622_p1 }
  0x85   :  { %418 = vmatmul.mubr.msk.f32.vlgmr.msra.gmra.mrb[0].mxu0 %vm128_vm1, %v124_v8  ;;  %441 = vmatprep.subr.bf16.mxu0 %v658_v0 }
  0x86   :  { %443 = vmatpush3.bf16.msra.mxu0 %v442_v9  ;;  %424 = vmatprep.mubr.msk.f32.mxu0 %vm659_vm0, %v660_v1  ;;  %p625_p4 = pnand %p624_p3, %p618_p0 }
  0x87   :  { %449 = vmatpush3.bf16.msra.mxu1 %v448_v16 }
  0x89   :  { %425 = vmatmul.mubr.msk.f32.vlgmr.msra.gmra.mrb[2].mxu0 %vm202_vm2, %v121_v10 }
 0x158   :  { %v198_v17 = vpop.f32.mrb[0].mxu0 }
 0x159   :  { %v419_v18 = vpop.f32.mrb[1].mxu0 }
 0x15c   :  { %v272_v19 = vpop.f32.mrb[2].mxu0 }
 0x15d   :  { %v273_v21 = vadd.f32 %v272_v19, %v198_v17  ;;  %v426_v22 = vpop.f32.mrb[3].mxu0 }
 0x15f   :  { %v283_v24 = vadd.f32 %v396_v20, %v273_v21 }
 0x161   :  { %v285_v26 = vmul.f32 %v284_v23, %v283_v24 }
 0x163   :  { %v287_v28 = vadd.f32 %v286_v25, %v285_v26 }
 0x165   :  { %v289_v29 = vadd.f32 %v288_v27, %v287_v28 }
 0x167   :  { %436 = vmatmul.mubr.msk.f32.vlgmr.msra.gmra.mrb[0].mxu1 %vm301_vm3, %v289_v29 }
 0x23a   :  { %v371_v31 = vpop.f32.mrb[0].mxu1 }
 0x23b   :  { %v372_v32 = vadd.f32 %v397_v30, %v371_v31  ;;  %v437_v33 = vpop.f32.mrb[1].mxu1 }
 0x23d   :  { %375 = vst.msk [vmem:[#allocation14] sm:$0xff] %vm301_vm3, %v372_v32 }
 0x23e   :  { %628 = shalt.err (!%p625_p4)
}
 0x23f   :  { %s629_s6 = scalar_lea.hbm %s844_s10, 128 }
 0x240   :  { %p630_p5 = scmp.ne.s32.totalorder %s844_s10, %s629_s6  ;;  %p633_p6 = scmp.lt.u32.totalorder %s629_s6, %s844_s10 }
 0x242   :  { %p635_p7 = pnand %p633_p6, %p630_p5 }
 0x244   :  { %638 = shalt.err (!%p635_p7)
}
 0x245   :  { %385 = dma.vmem_to_hbm [thread:$0]  %s383_s17, 128, %s844_s10, [#allocation4]  }
 0x246   :  { %647 = dma.done.wait [#allocation4], 128  }
 0x247   :  { %648 = vsyncadd [#allocation4], 4294967168 }
 0x248   :  { %389 = vsyncpa [#allocation3], 1 }
 0x249   :  { %390 = vsyncpa [#allocation6], 1 }
 0x24a   :  { %391 = vsyncpa [#allocation9], 1 }
 0x24b   :  { %392 = vsyncpa [#allocation12], 1 }
 0x24c   :  { %393 = vsyncpa [#allocation4], 1 }

</bundles_post_ra>
